<compile_context>
chip_gen: v7x
topology: tpu7x:2x2x1
jax: 0.10.0
libtpu: 0.0.40
codegen_flags: <defaults>
</compile_context>

<pallas_src>
import functools

import jax
import jax.numpy as jnp
from jax.experimental import pallas as pl
from jax.experimental.pallas import tpu as pltpu


def _round_up(v: int, m: int) -> int:
    return (v + m - 1) // m * m


# ----------------------------- Pallas kernel ------------------------------- #
def _deepsurv_kernel(n_layers, return_features, *refs):
    """refs = (x, w1, b1, ..., wL, bL, wh, bh, [features], logits, risk)."""
    x_ref = refs[0]
    layer_refs = refs[1:1 + 2 * n_layers]
    wh_ref = refs[1 + 2 * n_layers]      # (8, d_hid_pad), rows identical
    bh_ref = refs[2 + 2 * n_layers]      # (1, 1)
    out_refs = refs[3 + 2 * n_layers:]
    if return_features:
        feat_ref, logits_ref, risk_ref = out_refs
    else:
        feat_ref = None
        logits_ref, risk_ref = out_refs

    # MLP encoder: Linear -> ReLU, repeated n_layers times.  Matmuls run on the
    # MXU in mxu_dtype (f32 or bf16) with f32 accumulation; bias add + ReLU in f32.
    h = x_ref[...]
    mxu_dtype = h.dtype
    for layer in range(n_layers):
        w_ref = layer_refs[2 * layer]
        b_ref = layer_refs[2 * layer + 1]
        acc = jnp.dot(h.astype(mxu_dtype), w_ref[...],
                      preferred_element_type=jnp.float32)
        h = jnp.maximum(acc + b_ref[...].astype(jnp.float32), 0.0)  # ReLU, f32

    if return_features:
        feat_ref[...] = h.astype(feat_ref.dtype)

    # Head Linear(d_hid, 1): contract Wh(8, D) with h(TILE_B, D) over D
    # -> (8, TILE_B); row 0 is the logit row.  Batch ends up on lanes so the
    # logits/risk stores are lane-dense (unmasked), and the MXU does a tiny
    # full-N matmul instead of a wasteful N=1 GEMV.
    logits8 = jax.lax.dot_general(
        wh_ref[...].astype(jnp.float32), h,
        dimension_numbers=(((1,), (1,)), ((), ())),
        preferred_element_type=jnp.float32)
    logits_row = logits8[0:1, :] + bh_ref[...]                # (1, TILE_B)
    logits_ref[...] = logits_row[None].astype(logits_ref.dtype)
    risk_ref[...] = jax.nn.sigmoid(logits_row)[None].astype(risk_ref.dtype)


# --------------------------- tile-size selection ---------------------------- #
def _pick_tile_b(batch, resident_bytes, x_elt_bytes, d_in_pad, d_hid_pad,
                 vmem_budget):
    """Largest batch tile (<=512, multiple of 128) whose double-buffered working
    set fits the VMEM budget; small batches use a single tile."""
    if batch <= 512:
        return max(_round_up(batch, 8), 8)
    tile = 512
    while tile > 128:
        need = resident_bytes
        need += 2 * tile * d_in_pad * x_elt_bytes    # x blocks (double buffered)
        need += 2 * tile * d_hid_pad * 4             # features out blocks
        need += 2 * 2 * 2 * tile * 4                 # logits/risk out blocks
        need += 3 * tile * d_hid_pad * 4             # live in-kernel values (rough)
        if need <= vmem_budget:
            return tile
        tile -= 128
    return 128


# ------------------------------ JAX wrapper -------------------------------- #
def deepsurv_forward(x, params, *, mxu_dtype=jnp.float32, return_features=True,
                     interpret=False):
    """x: (B, n_features); params: dict of MLP + head weights (PyTorch layout
    transposed to (d_in, d_out) so every layer is x @ W + b)."""
    x = jnp.asarray(x, jnp.float32)
    B, n_features = x.shape
    n_layers = len(params["mlp_w"])
    d_hid = params["mlp_w"][0].shape[1]

    d_in_pad = _round_up(n_features, 128)
    d_hid_pad = _round_up(d_hid, 128)

    # ---- zero-pad params to lane/MXU-friendly sizes (results unchanged) ----
    mlp_w, mlp_b = [], []
    d_prev, d_prev_pad = n_features, d_in_pad
    for w, b in zip(params["mlp_w"], params["mlp_b"]):
        w = jnp.asarray(w, jnp.float32)
        b = jnp.asarray(b, jnp.float32).reshape(1, -1)
        w = jnp.pad(w, ((0, d_prev_pad - d_prev), (0, d_hid_pad - d_hid)))
        b = jnp.pad(b, ((0, 0), (0, d_hid_pad - d_hid)))
        mlp_w.append(w.astype(mxu_dtype))
        mlp_b.append(b)
        d_prev, d_prev_pad = d_hid, d_hid_pad

    wh = jnp.asarray(params["head_w"], jnp.float32).reshape(d_hid, 1)
    wh = jnp.pad(wh, ((0, d_hid_pad - d_hid), (0, 0)))   # (d_hid_pad, 1)
    wh = jnp.tile(wh.T, (8, 1))                          # (8, d_hid_pad)
    bh = jnp.asarray(params["head_b"], jnp.float32).reshape(1, 1)

    # ---- generation-aware VMEM budget + batch tiling ----
    try:
        vmem_cap = pltpu.get_tpu_info().vmem_capacity_bytes
    except Exception:
        vmem_cap = 64 * 1024 * 1024          # conservative (v7x per-core VMEM)
    vmem_limit = min(int(vmem_cap * 0.85), 100 * 1024 * 1024)

    x_elt = jnp.dtype(mxu_dtype).itemsize
    resident = sum(int(w.size) * x_elt for w in mlp_w)
    resident += sum(int(b.size) * 4 for b in mlp_b) + int(wh.size) * 4 + 4
    resident *= 2                            # Pallas double-buffers inputs
    tile_b = _pick_tile_b(B, resident, x_elt, d_in_pad, d_hid_pad,
                          int(vmem_limit * 0.8))
    b_pad = _round_up(B, tile_b)
    num_tiles = b_pad // tile_b

    x_p = jnp.pad(x, ((0, b_pad - B), (0, d_in_pad - n_features)))
    x_p = x_p.astype(mxu_dtype)

    inputs = [x_p]
    for w, b in zip(mlp_w, mlp_b):
        inputs += [w, b]
    inputs += [wh, bh]

    def const_spec(arr):
        # Full block, constant index map -> stays VMEM-resident across grid steps.
        return pl.BlockSpec(arr.shape, lambda i: (0,) * arr.ndim)

    in_specs = [pl.BlockSpec((tile_b, d_in_pad), lambda i: (i, 0))]
    in_specs += [const_spec(a) for a in inputs[1:]]

    out_shapes, out_specs = [], []
    if return_features:
        out_shapes.append(jax.ShapeDtypeStruct((b_pad, d_hid_pad), jnp.float32))
        out_specs.append(pl.BlockSpec((tile_b, d_hid_pad), lambda i: (i, 0)))
    # Lane-dense logits/risk: (num_tiles, 1, TILE_B) with batch on the lane axis.
    out_shapes += [jax.ShapeDtypeStruct((num_tiles, 1, tile_b), jnp.float32),
                   jax.ShapeDtypeStruct((num_tiles, 1, tile_b), jnp.float32)]
    out_specs += [pl.BlockSpec((1, 1, tile_b), lambda i: (i, 0, 0)),
                  pl.BlockSpec((1, 1, tile_b), lambda i: (i, 0, 0))]

    outs = pl.pallas_call(
        functools.partial(_deepsurv_kernel, n_layers, return_features),
        out_shape=tuple(out_shapes),
        grid=(num_tiles,),
        in_specs=in_specs,
        out_specs=tuple(out_specs),
        compiler_params=pltpu.CompilerParams(
            dimension_semantics=("parallel",),   # megacore-shardable on v7x
            vmem_limit_bytes=vmem_limit,
        ),
        interpret=interpret,
    )(*inputs)

    if return_features:
        feat_p, logits_t, risk_t = outs
        features = feat_p[:B, :d_hid]
    else:
        logits_t, risk_t = outs
        features = None

    logits = logits_t.reshape(-1)[:B].reshape(B, 1)
    risk = risk_t.reshape(-1)[:B]                       # .view(-1) in PyTorch
    return {"features": features, "logits": logits, "risk": risk}


# --------------------------- parameter construction ------------------------ #
def init_params(key, n_features, d_hid, n_layers):
    params = {"mlp_w": [], "mlp_b": []}
    d_in = n_features
    for _ in range(n_layers):
        key, kw, kb = jax.random.split(key, 3)
        scale = 1.0 / jnp.sqrt(jnp.float32(d_in))
        params["mlp_w"].append(
            jax.random.uniform(kw, (d_in, d_hid), jnp.float32, -scale, scale))
        params["mlp_b"].append(
            jax.random.uniform(kb, (1, d_hid), jnp.float32, -scale, scale))
        d_in = d_hid
    key, kw, kb = jax.random.split(key, 3)
    scale = 1.0 / jnp.sqrt(jnp.float32(d_hid))
    params["head_w"] = jax.random.uniform(kw, (d_hid, 1), jnp.float32, -scale, scale)
    params["head_b"] = jax.random.uniform(kb, (1, 1), jnp.float32, -scale, scale)
    return params


if __name__ == "__main__":
    def reference(x, params):
        h = x
        for w, b in zip(params["mlp_w"], params["mlp_b"]):
            h = jnp.maximum(h @ w + b, 0.0)
        logits = h @ params["head_w"] + params["head_b"]
        return h, logits, jax.nn.sigmoid(logits).reshape(-1)

    # Small shapes consistent with the module: batch=8, n_features=16,
    # d_hid=32, n_layers=2.
    B, N_FEATURES, D_HID, N_LAYERS = 8, 16, 32, 2
    key = jax.random.PRNGKey(0)
    key, kx = jax.random.split(key)
    x = jax.random.normal(kx, (B, N_FEATURES), dtype=jnp.float32)
    params = init_params(key, N_FEATURES, D_HID, N_LAYERS)

    # --- small, f32 MXU path ---
    out = deepsurv_forward(x, params)
    jax.block_until_ready(out)
    h_ref, logits_ref, risk_ref = reference(x, params)
    assert out["features"].shape == (B, D_HID)
    assert out["logits"].shape == (B, 1)
    assert out["risk"].shape == (B,)
    assert jnp.allclose(out["features"], h_ref, atol=1e-5), "features mismatch"
    assert jnp.allclose(out["logits"], logits_ref, atol=1e-5), "logits mismatch"
    assert jnp.allclose(out["risk"], risk_ref, atol=1e-5), "risk mismatch"

    # --- small, bf16 MXU path (f32 accumulation) ---
    out_bf16 = deepsurv_forward(x, params, mxu_dtype=jnp.bfloat16)
    jax.block_until_ready(out_bf16)
    assert jnp.allclose(out_bf16["risk"], risk_ref, atol=5e-2), "bf16 risk mismatch"

    # --- larger run exercising the multi-tile batch grid + padding paths ---
    B2, F2, H2, L2 = 1200, 37, 200, 3
    key, kx2, kp2 = jax.random.split(key, 3)
    x2 = jax.random.normal(kx2, (B2, F2), dtype=jnp.float32)
    params2 = init_params(kp2, F2, H2, L2)
    out2 = deepsurv_forward(x2, params2)
    jax.block_until_ready(out2)
    h2_ref, logits2_ref, risk2_ref = reference(x2, params2)
    assert out2["risk"].shape == (B2,)
    assert jnp.allclose(out2["features"], h2_ref, atol=2e-3, rtol=2e-3), "large features mismatch"
    assert jnp.allclose(out2["risk"], risk2_ref, atol=2e-3, rtol=2e-3), "large risk mismatch"

    # TODO(synk): CoxSurvLoss (compuite_loss) is a training-time loss, not part of
    # the forward hot path; it is not implemented as a kernel here.
    print("KERNEL_OK")
</pallas_src>

<mosaic_0001>
module attributes {stable_mosaic.version = 11 : i64} {
  func.func @_deepsurv_kernel(%arg0: i32, %arg1: memref<8x128xf32, #tpu.memory_space<vmem>>, %arg2: memref<128x128xf32, #tpu.memory_space<vmem>>, %arg3: memref<1x128xf32, #tpu.memory_space<vmem>>, %arg4: memref<128x128xf32, #tpu.memory_space<vmem>>, %arg5: memref<1x128xf32, #tpu.memory_space<vmem>>, %arg6: memref<8x128xf32, #tpu.memory_space<vmem>>, %arg7: memref<1x1xf32, #tpu.memory_space<vmem>>, %arg8: memref<8x128xf32, #tpu.memory_space<vmem>>, %arg9: memref<1x1x8xf32, #tpu.memory_space<vmem>>, %arg10: memref<1x1x8xf32, #tpu.memory_space<vmem>>) attributes {dimension_semantics = [#tpu.dimension_semantics<parallel>], iteration_bounds = array<i64: 1>, scalar_prefetch = 0 : i64, scratch_operands = 0 : i64, tpu.core_type = #tpu.core_type<tc>, window_params = [{transform_indices = @transform_0, window_bounds = array<i64: 8, 128>}, {pipeline_mode = #tpu.pipeline_mode<synchronous>, transform_indices = @transform_1, window_bounds = array<i64: 128, 128>}, {pipeline_mode = #tpu.pipeline_mode<synchronous>, transform_indices = @transform_2, window_bounds = array<i64: 1, 128>}, {pipeline_mode = #tpu.pipeline_mode<synchronous>, transform_indices = @transform_3, window_bounds = array<i64: 128, 128>}, {pipeline_mode = #tpu.pipeline_mode<synchronous>, transform_indices = @transform_4, window_bounds = array<i64: 1, 128>}, {pipeline_mode = #tpu.pipeline_mode<synchronous>, transform_indices = @transform_5, window_bounds = array<i64: 8, 128>}, {pipeline_mode = #tpu.pipeline_mode<synchronous>, transform_indices = @transform_6, window_bounds = array<i64: 1, 1>}, {transform_indices = @transform_7, window_bounds = array<i64: 8, 128>}, {transform_indices = @transform_8, window_bounds = array<i64: 1, 1, 8>}, {transform_indices = @transform_9, window_bounds = array<i64: 1, 1, 8>}]} {
    %c0 = arith.constant 0 : index
    %c0_0 = arith.constant 0 : index
    %0 = vector.load %arg1[%c0, %c0_0] : memref<8x128xf32, #tpu.memory_space<vmem>>, vector<8x128xf32>
    %c0_1 = arith.constant 0 : index
    %c0_2 = arith.constant 0 : index
    %1 = vector.load %arg2[%c0_1, %c0_2] : memref<128x128xf32, #tpu.memory_space<vmem>>, vector<128x128xf32>
    %cst = arith.constant dense<0.000000e+00> : vector<8x128xf32>
    %2 = tpu.matmul %0, %1, %cst {dimension_numbers = #tpu.dot_dimension_numbers<[1], [0], [0], [1], [0, 0, 1, 1], [], []>} : vector<8x128xf32>, vector<128x128xf32>, vector<8x128xf32> -> vector<8x128xf32>
    %c0_3 = arith.constant 0 : index
    %c0_4 = arith.constant 0 : index
    %3 = vector.load %arg3[%c0_3, %c0_4] : memref<1x128xf32, #tpu.memory_space<vmem>>, vector<1x128xf32>
    %4 = vector.broadcast %3 : vector<1x128xf32> to vector<8x128xf32>
    %5 = arith.addf %2, %4 : vector<8x128xf32>
    %cst_5 = arith.constant 0.000000e+00 : f32
    %6 = vector.broadcast %cst_5 : f32 to vector<8x128xf32>
    %7 = arith.maximumf %5, %6 : vector<8x128xf32>
    %c0_6 = arith.constant 0 : index
    %c0_7 = arith.constant 0 : index
    %8 = vector.load %arg4[%c0_6, %c0_7] : memref<128x128xf32, #tpu.memory_space<vmem>>, vector<128x128xf32>
    %cst_8 = arith.constant dense<0.000000e+00> : vector<8x128xf32>
    %9 = tpu.matmul %7, %8, %cst_8 {dimension_numbers = #tpu.dot_dimension_numbers<[1], [0], [0], [1], [0, 0, 1, 1], [], []>} : vector<8x128xf32>, vector<128x128xf32>, vector<8x128xf32> -> vector<8x128xf32>
    %c0_9 = arith.constant 0 : index
    %c0_10 = arith.constant 0 : index
    %10 = vector.load %arg5[%c0_9, %c0_10] : memref<1x128xf32, #tpu.memory_space<vmem>>, vector<1x128xf32>
    %11 = vector.broadcast %10 : vector<1x128xf32> to vector<8x128xf32>
    %12 = arith.addf %9, %11 : vector<8x128xf32>
    %cst_11 = arith.constant 0.000000e+00 : f32
    %13 = vector.broadcast %cst_11 : f32 to vector<8x128xf32>
    %14 = arith.maximumf %12, %13 : vector<8x128xf32>
    %c0_12 = arith.constant 0 : index
    %c0_13 = arith.constant 0 : index
    %15 = vector.load %arg8[%c0_12, %c0_13] : memref<8x128xf32, #tpu.memory_space<vmem>>, vector<8x128xf32>
    tpu.vector_store %arg8[%c0_12, %c0_13], %14 {strides = array<i32>} : memref<8x128xf32, #tpu.memory_space<vmem>>, vector<8x128xf32>,
    %c0_14 = arith.constant 0 : index
    %c0_15 = arith.constant 0 : index
    %16 = vector.load %arg6[%c0_14, %c0_15] : memref<8x128xf32, #tpu.memory_space<vmem>>, vector<8x128xf32>
    %cst_16 = arith.constant dense<0.000000e+00> : vector<8x8xf32>
    %17 = tpu.matmul %16, %14, %cst_16 {dimension_numbers = #tpu.dot_dimension_numbers<[1], [1], [0], [0], [0, 0, 1, 0], [], []>} : vector<8x128xf32>, vector<8x128xf32>, vector<8x8xf32> -> vector<8x8xf32>
    %18 = vector.extract_strided_slice %17 {offsets = [0, 0], sizes = [1, 8], strides = [1, 1]} : vector<8x8xf32> to vector<1x8xf32>
    %c0_17 = arith.constant 0 : index
    %c0_18 = arith.constant 0 : index
    %19 = vector.load %arg7[%c0_17, %c0_18] : memref<1x1xf32, #tpu.memory_space<vmem>>, vector<1x1xf32>
    %20 = vector.broadcast %19 : vector<1x1xf32> to vector<1x8xf32>
    %21 = arith.addf %18, %20 : vector<1x8xf32>
    %22 = vector.shape_cast %21 : vector<1x8xf32> to vector<1x1x8xf32>
    %c0_19 = arith.constant 0 : index
    %c0_20 = arith.constant 0 : index
    %c0_21 = arith.constant 0 : index
    %23 = vector.load %arg9[%c0_19, %c0_20, %c0_21] : memref<1x1x8xf32, #tpu.memory_space<vmem>>, vector<1x1x8xf32>
    tpu.vector_store %arg9[%c0_19, %c0_20, %c0_21], %22 {strides = array<i32>} : memref<1x1x8xf32, #tpu.memory_space<vmem>>, vector<1x1x8xf32>,
    %24 = arith.negf %21 : vector<1x8xf32>
    %25 = math.exp %24 : vector<1x8xf32>
    %cst_22 = arith.constant 1.000000e+00 : f32
    %26 = vector.broadcast %cst_22 : f32 to vector<1x8xf32>
    %27 = arith.addf %26, %25 : vector<1x8xf32>
    %28 = arith.divf %26, %27 : vector<1x8xf32>
    %29 = vector.shape_cast %28 : vector<1x8xf32> to vector<1x1x8xf32>
    %c0_23 = arith.constant 0 : index
    %c0_24 = arith.constant 0 : index
    %c0_25 = arith.constant 0 : index
    %30 = vector.load %arg10[%c0_23, %c0_24, %c0_25] : memref<1x1x8xf32, #tpu.memory_space<vmem>>, vector<1x1x8xf32>
    tpu.vector_store %arg10[%c0_23, %c0_24, %c0_25], %29 {strides = array<i32>} : memref<1x1x8xf32, #tpu.memory_space<vmem>>, vector<1x1x8xf32>,
    return
  }
  func.func @transform_0(%arg0: i32) -> (i32, i32) {
    %c0_i32 = arith.constant 0 : i32
    %c0_i32_0 = arith.constant 0 : i32
    return %arg0, %c0_i32 : i32, i32
  }
  func.func @transform_1(%arg0: i32) -> (i32, i32) {
    %c0_i32 = arith.constant 0 : i32
    %c0_i32_0 = arith.constant 0 : i32
    %c0_i32_1 = arith.constant 0 : i32
    return %c0_i32, %c0_i32_0 : i32, i32
  }
  func.func @transform_2(%arg0: i32) -> (i32, i32) {
    %c0_i32 = arith.constant 0 : i32
    %c0_i32_0 = arith.constant 0 : i32
    %c0_i32_1 = arith.constant 0 : i32
    return %c0_i32, %c0_i32_0 : i32, i32
  }
  func.func @transform_3(%arg0: i32) -> (i32, i32) {
    %c0_i32 = arith.constant 0 : i32
    %c0_i32_0 = arith.constant 0 : i32
    %c0_i32_1 = arith.constant 0 : i32
    return %c0_i32, %c0_i32_0 : i32, i32
  }
  func.func @transform_4(%arg0: i32) -> (i32, i32) {
    %c0_i32 = arith.constant 0 : i32
    %c0_i32_0 = arith.constant 0 : i32
    %c0_i32_1 = arith.constant 0 : i32
    return %c0_i32, %c0_i32_0 : i32, i32
  }
  func.func @transform_5(%arg0: i32) -> (i32, i32) {
    %c0_i32 = arith.constant 0 : i32
    %c0_i32_0 = arith.constant 0 : i32
    %c0_i32_1 = arith.constant 0 : i32
    return %c0_i32, %c0_i32_0 : i32, i32
  }
  func.func @transform_6(%arg0: i32) -> (i32, i32) {
    %c0_i32 = arith.constant 0 : i32
    %c0_i32_0 = arith.constant 0 : i32
    %c0_i32_1 = arith.constant 0 : i32
    return %c0_i32, %c0_i32_0 : i32, i32
  }
  func.func @transform_7(%arg0: i32) -> (i32, i32) {
    %c0_i32 = arith.constant 0 : i32
    %c0_i32_0 = arith.constant 0 : i32
    return %arg0, %c0_i32 : i32, i32
  }
  func.func @transform_8(%arg0: i32) -> (i32, i32, i32) {
    %c0_i32 = arith.constant 0 : i32
    %c0_i32_0 = arith.constant 0 : i32
    %c0_i32_1 = arith.constant 0 : i32
    return %arg0, %c0_i32, %c0_i32_0 : i32, i32, i32
  }
  func.func @transform_9(%arg0: i32) -> (i32, i32, i32) {
    %c0_i32 = arith.constant 0 : i32
    %c0_i32_0 = arith.constant 0 : i32
    %c0_i32_1 = arith.constant 0 : i32
    return %arg0, %c0_i32, %c0_i32_0 : i32, i32, i32
  }
}

</mosaic_0001>

<bundles_post_ra>
// kernel: tpu_custom_call.1
= control target key start
LH: loop header
LB: loop body
LE: loop exit
PB: predicated region body
PF: predicated region fallthrough
CT: control target
= control target key end

     0   :  { %s892_s0 = inlined_call_operand.hbm [shape: f32[8,128], index: 0, kind: input, shape index: {}]   ;;  %s893_s1 = inlined_call_operand.hbm [shape: f32[128,128], index: 1, kind: input, shape index: {}]   ;;  %s894_s2 = inlined_call_operand.vmem [shape: f32[1,128], index: 2, kind: input, shape index: {}]   ;;  %s895_s3 = inlined_call_operand.hbm [shape: f32[128,128], index: 3, kind: input, shape index: {}]   ;;  %s896_s4 = inlined_call_operand.vmem [shape: f32[1,128], index: 4, kind: input, shape index: {}]   ;;  %s897_s5 = inlined_call_operand.vmem [shape: f32[8,128], index: 5, kind: input, shape index: {}]   ;;  %s898_s6 = inlined_call_operand.<no memory space> [shape: f32[1,1], index: 6, kind: input, shape index: {}]   ;;  %s899_s7 = inlined_call_operand.hbm [shape: f32[8,128], index: 7, kind: output, shape index: {0}]   ;;  %s900_s8 = inlined_call_operand.hbm [shape: f32[1,1,8], index: 8, kind: output, shape index: {1}]   ;;  %s901_s9 = inlined_call_operand.hbm [shape: f32[1,1,8], index: 9, kind: output, shape index: {2}]  }
   0x1   :  { %v15_v0 = vstv %s898_s6 }
   0x2   :  { %16 = vst [vmem:[#allocation2] sm:$0x1] %v15_v0 }
   0x3   :  { %17 = vsyncpa [#allocation4], 0 }
   0x4   :  { %18 = vsyncpa [#allocation7], 0 }
   0x5   :  { %19 = vsyncpa [#allocation5], 0 }
   0x6   :  { %20 = vsyncpa [#allocation11], 0  ;;  %s715_s11 = smov [#allocation6]   ;;  %s575_s15 = scalar_lea.hbm %s893_s1, 2048 }
   0x7   :  { %s36_s12 = sshll.u32 %s715_s11, 4  ;;  %p576_p0 = scmp.ne.s32.totalorder %s893_s1, %s575_s15  ;;  %s37_s12 = int_to_ptr.vmem [resolvable:$true] %s36_s12 }
   0x8   :  { %p579_p1 = scmp.lt.u32.totalorder %s575_s15, %s893_s1 }
   0xa   :  { %p581_p2 = pnand %p579_p1, %p576_p0 }
   0xc   :  { %584 = shalt.err (!%p581_p2)
}
   0xd   :  { %s585_s6 = scalar_lea.vmem %s37_s12, 2048  ;;  %p590_p4 = scmp.lt.s32.totalorder %s37_s12, %s37_s12 }
   0xe   :  { %p586_p3 = scmp.ne.s32.totalorder %s37_s12, %s585_s6  ;;  %p591_p5 = scmp.lt.s32.totalorder %s585_s6, %s585_s6 }
  0x10   :  { %p592_p6 = por %p591_p5, %p590_p4 }
  0x12   :  { %p593_p7 = pnand %p592_p6, %p586_p3 }
  0x14   :  { %596 = shalt.err (!%p593_p7)
}
  0x15   :  { %s716_s20 = smov 128   ;;  %s717_s21 = smov 8  }
  0x16   :  { %42 = dma.hbm_to_vmem [thread:$0]  %s893_s1, 2048, %s37_s12, [#allocation7], %s716_s20, %s716_s20, %s717_s21  }
  0x17   :  { %s718_s24 = smov [#allocation3]   ;;  %s719_s26 = smov [#allocation8]  }
  0x18   :  { %s27_s25 = sshll.u32 %s718_s24, 4  ;;  %s50_s27 = sshll.u32 %s719_s26, 4  ;;  %s28_s25 = int_to_ptr.vmem [resolvable:$true] %s27_s25  ;;  %s51_s27 = int_to_ptr.vmem [resolvable:$true] %s50_s27 }
  0x19   :  { %s597_s30 = scalar_lea.hbm %s892_s0, 128 }
  0x1a   :  { %p598_p8 = scmp.ne.s32.totalorder %s892_s0, %s597_s30  ;;  %p601_p9 = scmp.lt.u32.totalorder %s597_s30, %s892_s0 }
  0x1c   :  { %p603_p10 = pnand %p601_p9, %p598_p8 }
  0x1e   :  { %606 = shalt.err (!%p603_p10)
}
  0x1f   :  { %s607_s1 = scalar_lea.vmem %s28_s25, 128  ;;  %p612_p12 = scmp.lt.s32.totalorder %s28_s25, %s28_s25 }
  0x20   :  { %p608_p11 = scmp.ne.s32.totalorder %s28_s25, %s607_s1  ;;  %p613_p13 = scmp.lt.s32.totalorder %s607_s1, %s607_s1 }
  0x22   :  { %p614_p0 = por %p613_p13, %p612_p12 }
  0x24   :  { %p615_p1 = pnand %p614_p0, %p608_p11 }
  0x26   :  { %618 = shalt.err (!%p615_p1)
}
  0x27   :  { %30 = dma.hbm_to_vmem [thread:$0]  %s892_s0, 128, %s28_s25, [#allocation4]  }
  0x28   :  { %s619_s18 = scalar_lea.hbm %s895_s3, 2048 }
  0x29   :  { %p620_p2 = scmp.ne.s32.totalorder %s895_s3, %s619_s18  ;;  %p623_p3 = scmp.lt.u32.totalorder %s619_s18, %s895_s3 }
  0x2b   :  { %p625_p4 = pnand %p623_p3, %p620_p2 }
  0x2d   :  { %628 = shalt.err (!%p625_p4)
}
  0x2e   :  { %s629_s24 = scalar_lea.vmem %s51_s27, 2048  ;;  %p634_p6 = scmp.lt.s32.totalorder %s51_s27, %s51_s27 }
  0x2f   :  { %p630_p5 = scmp.ne.s32.totalorder %s51_s27, %s629_s24  ;;  %p635_p7 = scmp.lt.s32.totalorder %s629_s24, %s629_s24 }
  0x31   :  { %p636_p8 = por %p635_p7, %p634_p6 }
  0x33   :  { %p637_p9 = pnand %p636_p8, %p630_p5 }
  0x35   :  { %640 = shalt.err (!%p637_p9)
}
  0x36   :  { %56 = dma.hbm_to_vmem [thread:$0]  %s895_s3, 2048, %s51_s27, [#allocation7], %s716_s20, %s716_s20, %s717_s21  }
  0x37   :  { %707 = dma.done.wait [#allocation4], 128  }
  0x38   :  { %708 = vsyncadd [#allocation4], 4294967168 }
  0x39   :  { %709 = dma.done.wait [#allocation7], 4096  }
  0x3a   :  { %710 = vsyncadd [#allocation7], 4294963200  ;;  %v720_v1 = vmov 0.0|0.0   ;;  %vm721_vm0 = vmmov 0   ;;  %v722_v2 = vmov 0.0   ;;  %v73_v3 = vld [vmem:[#allocation6] sm:$0xff] }
  0x3b   :  { %510 = vmatprep.subr.bf16.mxu0 %v720_v1  ;;  %467 = vmatprep.mubr.msk.f32.mxu0 %vm721_vm0, %v722_v2  ;;  %v74_v4 = vld [vmem:[#allocation6 + $0x8] sm:$0xff]  ;;  %v75_v5 = vld [vmem:[#allocation6 + $0x10] sm:$0xff]  ;;  %v76_v7 = vld [vmem:[#allocation6 + $0x18] sm:$0xff]  ;;  %v723_v58 = vmov 0   ;;  %s724_s28 = smov [#allocation9]  }
  0x3c   :  { %534 = vmatprep.subr.bf16.mxu1 %v720_v1  ;;  %502 = vmatprep.mubr.msk.f32.mxu1 %vm721_vm0, %v722_v2  ;;  %v511_v6 = vpack.c.bf16 %v74_v4, %v73_v3  ;;  %v514_v8 = vpack.c.bf16 %v76_v7, %v75_v5  ;;  %v77_v9 = vld [vmem:[#allocation6 + $0x20] sm:$0xff]  ;;  %v78_v10 = vld [vmem:[#allocation6 + $0x28] sm:$0xff]  ;;  %v169_v13 = vld [vmem:[#allocation8 + $0x10] sm:$0xff]  ;;  %s359_s29 = sshll.u32 %s724_s28, 4  ;;  %s360_s29 = int_to_ptr.vmem [resolvable:$true] %s359_s29 }
  0x3d   :  { %v167_v11 = vld [vmem:[#allocation8] sm:$0xff]  ;;  %v168_v12 = vld [vmem:[#allocation8 + $0x8] sm:$0xff]  ;;  %v170_v14 = vld [vmem:[#allocation8 + $0x18] sm:$0xff]  ;;  %v517_v15 = vpack.c.bf16 %v78_v10, %v77_v9  ;;  %570 = vset.pattern.permute.xlu0 %v723_v58  ;;  %s641_s30 = scalar_lea.vmem %s360_s29, 128  ;;  %p646_p11 = scmp.lt.s32.totalorder %s360_s29, %s360_s29 }
  0x3e   :  { %512 = vmatpush3.bf16.msra.mxu0 %v511_v6  ;;  %v535_v16 = vpack.c.bf16 %v168_v12, %v167_v11  ;;  %v79_v17 = vld [vmem:[#allocation6 + $0x30] sm:$0xff]  ;;  %v80_v18 = vld [vmem:[#allocation6 + $0x38] sm:$0xff]  ;;  %v538_v19 = vpack.c.bf16 %v170_v14, %v169_v13  ;;  %v171_v20 = vld [vmem:[#allocation8 + $0x20] sm:$0xff]  ;;  %p642_p10 = scmp.ne.s32.totalorder %s360_s29, %s641_s30  ;;  %p647_p12 = scmp.lt.s32.totalorder %s641_s30, %s641_s30 }
  0x3f   :  { %513 = vmatprep.subr.bf16.mxu0 %v720_v1  ;;  %v172_v21 = vld [vmem:[#allocation8 + $0x28] sm:$0xff]  ;;  %v520_v22 = vpack.c.bf16 %v80_v18, %v79_v17  ;;  %v81_v23 = vld [vmem:[#allocation6 + $0x40] sm:$0xff]  ;;  %v173_v26 = vld [vmem:[#allocation8 + $0x30] sm:$0xff] }
  0x40   :  { %536 = vmatpush3.bf16.msra.mxu1 %v535_v16  ;;  %v82_v24 = vld [vmem:[#allocation6 + $0x48] sm:$0xff]  ;;  %v541_v25 = vpack.c.bf16 %v172_v21, %v171_v20  ;;  %v174_v27 = vld [vmem:[#allocation8 + $0x38] sm:$0xff]  ;;  %v83_v29 = vld [vmem:[#allocation6 + $0x50] sm:$0xff]  ;;  %p648_p13 = por %p647_p12, %p646_p11 }
  0x41   :  { %537 = vmatprep.subr.bf16.mxu1 %v720_v1  ;;  %v523_v28 = vpack.c.bf16 %v82_v24, %v81_v23  ;;  %v84_v30 = vld [vmem:[#allocation6 + $0x58] sm:$0xff]  ;;  %v544_v31 = vpack.c.bf16 %v174_v27, %v173_v26  ;;  %v175_v32 = vld [vmem:[#allocation8 + $0x40] sm:$0xff]  ;;  %v176_v33 = vld [vmem:[#allocation8 + $0x48] sm:$0xff] }
  0x42   :  { %515 = vmatpush3.bf16.msra.mxu0 %v514_v8  ;;  %v526_v34 = vpack.c.bf16 %v84_v30, %v83_v29  ;;  %v85_v35 = vld [vmem:[#allocation6 + $0x60] sm:$0xff]  ;;  %v86_v36 = vld [vmem:[#allocation6 + $0x68] sm:$0xff]  ;;  %v547_v37 = vpack.c.bf16 %v176_v33, %v175_v32  ;;  %v177_v38 = vld [vmem:[#allocation8 + $0x50] sm:$0xff]  ;;  %p649_p0 = pnand %p648_p13, %p642_p10 }
  0x43   :  { %516 = vmatprep.subr.bf16.mxu0 %v720_v1  ;;  %v178_v39 = vld [vmem:[#allocation8 + $0x58] sm:$0xff]  ;;  %v529_v40 = vpack.c.bf16 %v86_v36, %v85_v35  ;;  %v87_v41 = vld [vmem:[#allocation6 + $0x70] sm:$0xff]  ;;  %v179_v44 = vld [vmem:[#allocation8 + $0x60] sm:$0xff] }
  0x44   :  { %539 = vmatpush3.bf16.msra.mxu1 %v538_v19  ;;  %v88_v42 = vld [vmem:[#allocation6 + $0x78] sm:$0xff]  ;;  %v550_v43 = vpack.c.bf16 %v178_v39, %v177_v38  ;;  %v180_v45 = vld [vmem:[#allocation8 + $0x68] sm:$0xff]  ;;  %v181_v49 = vld [vmem:[#allocation8 + $0x70] sm:$0xff] }
  0x45   :  { %540 = vmatprep.subr.bf16.mxu1 %v720_v1  ;;  %v532_v46 = vpack.c.bf16 %v88_v42, %v87_v41  ;;  %v553_v47 = vpack.c.bf16 %v180_v45, %v179_v44  ;;  %v72_v48 = vld [vmem:[#allocation3] sm:$0xff]  ;;  %v396_v52 = vld [vmem:[%s894_s2] ss:$0 sm:$0xff] }
  0x46   :  { %518 = vmatpush3.bf16.msra.mxu0 %v517_v15  ;;  %v182_v50 = vld [vmem:[#allocation8 + $0x78] sm:$0xff]  ;;  %v333_v57 = vld [vmem:[#allocation2] sm:$0x1] }
  0x47   :  { %519 = vmatprep.subr.bf16.mxu0 %v720_v1  ;;  %v556_v51 = vpack.c.bf16 %v182_v50, %v181_v49  ;;  %336 = vperm.xlu0 %570, %v333_v57   ;;  %v397_v59 = vld [vmem:[%s896_s4] ss:$0 sm:$0xff] }
  0x48   :  { %542 = vmatpush3.bf16.msra.mxu1 %v541_v25  ;;  %v262_v0 = vld [vmem:[%s897_s5] sm:$0xff] }
  0x49   :  { %543 = vmatprep.subr.bf16.mxu1 %v720_v1 }
  0x4a   :  { %521 = vmatpush3.bf16.msra.mxu0 %v520_v22 }
  0x4b   :  { %522 = vmatprep.subr.bf16.mxu0 %v720_v1 }
  0x4c   :  { %545 = vmatpush3.bf16.msra.mxu1 %v544_v31 }
  0x4d   :  { %546 = vmatprep.subr.bf16.mxu1 %v720_v1 }
  0x4e   :  { %524 = vmatpush3.bf16.msra.mxu0 %v523_v28 }
  0x4f   :  { %525 = vmatprep.subr.bf16.mxu0 %v720_v1 }
  0x50   :  { %548 = vmatpush3.bf16.msra.mxu1 %v547_v37 }
  0x51   :  { %549 = vmatprep.subr.bf16.mxu1 %v720_v1 }
  0x52   :  { %527 = vmatpush3.bf16.msra.mxu0 %v526_v34 }
  0x53   :  { %528 = vmatprep.subr.bf16.mxu0 %v720_v1 }
  0x54   :  { %551 = vmatpush3.bf16.msra.mxu1 %v550_v43 }
  0x55   :  { %552 = vmatprep.subr.bf16.mxu1 %v720_v1 }
  0x56   :  { %530 = vmatpush3.bf16.msra.mxu0 %v529_v40 }
  0x57   :  { %531 = vmatprep.subr.bf16.mxu0 %v720_v1 }
  0x58   :  { %554 = vmatpush3.bf16.msra.mxu1 %v553_v47 }
  0x59   :  { %555 = vmatprep.subr.bf16.mxu1 %v720_v1 }
  0x5a   :  { %533 = vmatpush3.bf16.msra.mxu0 %v532_v46 }
  0x5b   :  { %505 = vmatprep.subr.mxu0 %v722_v2 }
  0x5c   :  { %557 = vmatpush3.bf16.msra.mxu1 %v556_v51 }
  0x5d   :  { %468 = vmatmul.mubr.f32.vlgmr.msra.gmra.mrb[0].mxu0 %v72_v48 }
  0x5e   :  { %507 = vmatprep.mubr.msk.f32.mxu0 %vm721_vm0, %v722_v2 }
 0x130   :  { %v162_v53 = vpop.f32.mrb[0].mxu0 }
 0x131   :  { %v163_v54 = vadd.f32 %v396_v52, %v162_v53  ;;  %v469_v55 = vpop.f32.mrb[1].mxu0 }
 0x133   :  { %v166_v56 = vmax.f32 %v163_v54, 0.0 }
 0x135   :  { %503 = vmatmul.mubr.f32.vlgmr.msra.gmra.mrb[0].mxu1 %v166_v56 }
 0x208   :  { %v256_v60 = vpop.f32.mrb[0].mxu1 }
 0x209   :  { %v257_v61 = vadd.f32 %v397_v59, %v256_v60  ;;  %v504_v62 = vpop.f32.mrb[1].mxu1 }
 0x20b   :  { %v260_v63 = vmax.f32 %v257_v61, 0.0 }
 0x20d   :  { %261 = vst [vmem:[#allocation9] sm:$0xff] %v260_v63  ;;  %506 = vmatpush3.xpose.msra.mxu0 %v260_v63 }
 0x210   :  { %508 = vmatmul.mubr.f32.vlgmr.msra.gmra.mrb[2].mxu0 %v262_v0 }
 0x211   :  { %652 = shalt.err (!%p649_p0)
}
 0x212   :  { %s653_s11 = scalar_lea.hbm %s899_s7, 128 }
 0x213   :  { %p654_p1 = scmp.ne.s32.totalorder %s899_s7, %s653_s11  ;;  %p657_p2 = scmp.lt.u32.totalorder %s653_s11, %s899_s7 }
 0x215   :  { %p659_p3 = pnand %p657_p2, %p654_p1 }
 0x217   :  { %662 = shalt.err (!%p659_p3)
}
 0x218   :  { %362 = dma.vmem_to_hbm [thread:$0]  %s360_s29, 128, %s899_s7, [#allocation5]   ;;  %v339_v1 = vlaneseq  ;;  %v337_v4 = vpop.permute.xlu0 %336  ;;  %vm344_vm1 = vcmask 57344  }
 0x219   :  { %s725_s16 = smov [#allocation10]  }
 0x21a   :  { %v340_v2 = vshrl.u32 %v339_v1, 7  ;;  %s369_s17 = sshll.u32 %s725_s16, 4  ;;  %s370_s17 = int_to_ptr.vmem [resolvable:$true] %s369_s17 }
 0x21b   :  { %s663_s18 = scalar_lea.vmem %s370_s17, 16  ;;  %s667_s19 = scalar_lea.vmem %s370_s17, 32 }
 0x21c   :  { %v341_v3 = vsub.s32 0, %v340_v2  ;;  %p664_p4 = scmp.ne.s32.totalorder %s370_s17, %s663_s18  ;;  %p668_p5 = scmp.lt.s32.totalorder %s370_s17, %s370_s17 }
 0x21d   :  { %p669_p6 = scmp.lt.s32.totalorder %s667_s19, %s663_s18 }
 0x21e   :  { %v342_v5 = vrot.slane %v337_v4, %v341_v3 }
 0x21f   :  { %p670_p7 = por %p669_p6, %p668_p5 }
 0x221   :  { %p671_p8 = pnand %p670_p7, %p664_p4 }
 0x2e3   :  { %v329_v6 = vpop.f32.mrb[2].mxu0 }
 0x2e4   :  { %v343_v7 = vadd.f32 %v342_v5, %v329_v6  ;;  %v509_v8 = vpop.f32.mrb[3].mxu0 }
 0x2e6   :  { %v398_v9 = vmul.f32 -1.442695, %v343_v7  ;;  %345 = vst.msk [vmem:[#allocation10] sm:$0x1] %vm344_vm1, %v343_v7 }
 0x2e7   :  { %674 = shalt.err (!%p671_p8)
}
 0x2e8   :  { %s675_s22 = scalar_lea.hbm %s900_s8, 16 }
 0x2e9   :  { %p676_p9 = scmp.ne.s32.totalorder %s900_s8, %s675_s22  ;;  %p679_p10 = scmp.lt.u32.totalorder %s675_s22, %s900_s8 }
 0x2eb   :  { %p681_p11 = pnand %p679_p10, %p676_p9 }
 0x2ed   :  { %684 = shalt.err (!%p681_p11)
}
 0x2ee   :  { %372 = dma.vmem_to_hbm [thread:$0]  %s370_s17, 16, %s900_s8, [#allocation11]   ;;  %571 = vpow2.f32 %v398_v9 }
 0x2ef   :  { %s726_s21 = smov [#allocation12]  }
 0x2f0   :  { %s379_s26 = sshll.u32 %s726_s21, 4  ;;  %s380_s26 = int_to_ptr.vmem [resolvable:$true] %s379_s26 }
 0x2f1   :  { %s685_s2 = scalar_lea.vmem %s380_s26, 16  ;;  %s689_s27 = scalar_lea.vmem %s380_s26, 32 }
 0x2f2   :  { %p686_p12 = scmp.ne.s32.totalorder %s380_s26, %s685_s2  ;;  %p690_p13 = scmp.lt.s32.totalorder %s380_s26, %s380_s26 }
 0x2f3   :  { %p691_p0 = scmp.lt.s32.totalorder %s689_s27, %s685_s2 }
 0x2f5   :  { %p692_p1 = por %p691_p0, %p690_p13 }
 0x2f7   :  { %p693_p2 = pnand %p692_p1, %p686_p12 }
 0x2f8   :  { %v572_v10 = vpop.eup %571 }
 0x2f9   :  { %v349_v11 = vadd.f32 1.0, %v572_v10 }
 0x2fb   :  { %573 = vrcp.f32 %v349_v11 }
 0x305   :  { %v574_v12 = vpop.eup %573 }
 0x306   :  { %352 = vst.msk [vmem:[#allocation12] sm:$0x1] %vm344_vm1, %v574_v12 }
 0x307   :  { %696 = shalt.err (!%p693_p2)
}
 0x308   :  { %s697_s29 = scalar_lea.hbm %s901_s9, 16 }
 0x309   :  { %p698_p3 = scmp.ne.s32.totalorder %s901_s9, %s697_s29  ;;  %p701_p4 = scmp.lt.u32.totalorder %s697_s29, %s901_s9 }
 0x30b   :  { %p703_p5 = pnand %p701_p4, %p698_p3 }
 0x30d   :  { %706 = shalt.err (!%p703_p5)
}
 0x30e   :  { %382 = dma.vmem_to_hbm [thread:$0]  %s380_s26, 16, %s901_s9, [#allocation11]  }
 0x30f   :  { %711 = dma.done.wait [#allocation5], 128  }
 0x310   :  { %712 = vsyncadd [#allocation5], 4294967168 }
 0x311   :  { %713 = dma.done.wait [#allocation11], 32  }
 0x312   :  { %714 = vsyncadd [#allocation11], 4294967264 }
 0x313   :  { %392 = vsyncpa [#allocation4], 1 }
 0x314   :  { %393 = vsyncpa [#allocation7], 1 }
 0x315   :  { %394 = vsyncpa [#allocation5], 1 }
 0x316   :  { %395 = vsyncpa [#allocation11], 1 }

</bundles_post_ra>
